<compile_context>
chip_gen: v7x
topology: tpu7x:2x2x1
jax: 0.10.0
libtpu: 0.0.40
codegen_flags: <defaults>
</compile_context>

<pallas_src>
import math

import numpy as np
import jax
import jax.numpy as jnp
from jax.experimental import pallas as pl
from jax.experimental.pallas import tpu as pltpu

# ---------------- constants matching NiftyNet 'percentile' mode --------------
_RANGE_TO_USE = np.array([0, 1, 2, 4, 5, 6, 7, 8, 10, 11, 12], dtype=np.int32)
_NUM_LANDMARKS = len(_RANGE_TO_USE)      # 11
_NUM_BINS = _NUM_LANDMARKS - 1           # 10 affine segments
_NUM_BOUNDS = _NUM_BINS - 1              # 9 interior boundaries

_LANE = 128                              # TPU lane width
_ROW_MIN = 8                             # sublane granularity
_MAX_BLOCK_BYTES = 2 * 1024 * 1024       # 2 MiB/block -> 8 MiB live with
                                         # in+out double buffering
_MIN_GRID = 2                            # keep >=2 grid steps so v7x's two
                                         # TensorCores both get work

# Packed coefficient table layout (rows of the [32, W] VMEM array):
_SLOPE_ROW = 0        # rows  0..9  : per-lane slope of bins 0..9
_ICPT_ROW = 10        # rows 10..19 : per-lane intercept of bins 0..9
_BOUND_ROW = 20       # rows 20..28 : per-lane interior boundaries 0..8
_COEF_ROWS = 32       # padded up to a sublane multiple


# ------------------------------- Pallas kernel --------------------------------
def _hist_norm_kernel(coef_ref, x_ref, o_ref):
    """Piece-wise linear intensity transform over one [BR, W] block.

    coef_ref : VMEM f32 [32, W]  packed per-lane affine table
                                 (lane l carries modality l % M).
    x_ref    : VMEM f32 [BR, W]  voxels in natural (modality-interleaved) order.
    o_ref    : VMEM f32 [BR, W]
    """
    br, w = x_ref.shape
    n_groups = w // _LANE
    # Process one 128-lane column group at a time so only ~29 coefficient vregs
    # are live regardless of W = lcm(M, 128) (avoids spills for M !| 128).
    for g in range(n_groups):
        lo, hi = g * _LANE, (g + 1) * _LANE
        x = x_ref[:, lo:hi]

        # Hoist every coefficient-row load out of the 9-iteration sweep: one
        # static slice read per row, reused by all compares / selects below.
        slopes = [coef_ref[_SLOPE_ROW + j:_SLOPE_ROW + j + 1, lo:hi]
                  for j in range(_NUM_BINS)]
        icpts = [coef_ref[_ICPT_ROW + j:_ICPT_ROW + j + 1, lo:hi]
                 for j in range(_NUM_BINS)]
        bounds = [coef_ref[_BOUND_ROW + j:_BOUND_ROW + j + 1, lo:hi]
                  for j in range(_NUM_BOUNDS)]

        # Boundary sweep selecting slope / intercept (== np.digitize(x, bounds,
        # right=False) incl. tie / degenerate-boundary handling), then ONE
        # affine op.
        s_sel = slopes[0]
        ic_sel = icpts[0]
        for j in range(_NUM_BOUNDS):
            ge = x >= bounds[j]
            s_sel = jnp.where(ge, slopes[j + 1], s_sel)
            ic_sel = jnp.where(ge, icpts[j + 1], ic_sel)
        o_ref[:, lo:hi] = s_sel * x + ic_sel


# ------------------------------ tiling helpers ---------------------------------
def _lane_width(num_mod):
    """Smallest multiple of 128 that is also a multiple of M, so that lane l
    always holds modality l % M for the natural contiguous layout."""
    return (_LANE * num_mod) // math.gcd(_LANE, num_mod)


def _pick_block_rows(rows_needed, width):
    """Largest block that (a) fits the 2 MiB budget and (b) still leaves at
    least _MIN_GRID grid steps so the parallel axis can split across the two
    v7x TensorCores (no-op on single-TC v5e / v6e)."""
    cap = max(_ROW_MIN,
              (_MAX_BLOCK_BYTES // (4 * width)) // _ROW_MIN * _ROW_MIN)
    split = max(_ROW_MIN,
                pl.cdiv(pl.cdiv(rows_needed, _MIN_GRID), _ROW_MIN) * _ROW_MIN)
    return min(cap, split)


def _piecewise_linear_pallas(x2d, coef, block_rows):
    """x2d: [R, W] f32, coef: [32, W] f32.  R need NOT divide block_rows:
    the ragged trailing block is handled by Pallas (masked writeback)."""
    R, W = x2d.shape
    n_elem = R * W
    return pl.pallas_call(
        _hist_norm_kernel,
        out_shape=jax.ShapeDtypeStruct((R, W), jnp.float32),
        grid=(pl.cdiv(R, block_rows),),
        in_specs=[
            # coefficient table: constant block index -> stays resident (no re-DMA)
            pl.BlockSpec((_COEF_ROWS, W), lambda r: (0, 0)),
            pl.BlockSpec((block_rows, W), lambda r: (r, 0)),
        ],
        out_specs=pl.BlockSpec((block_rows, W), lambda r: (r, 0)),
        compiler_params=pltpu.CompilerParams(
            dimension_semantics=("parallel",)),
        cost_estimate=pl.CostEstimate(
            flops=29 * n_elem, transcendentals=0, bytes_accessed=8 * n_elem),
    )(coef, x2d)


# ------------------------------- layer wrapper ---------------------------------
def _standardise_cutoff(cutoff, norm_type='percentile'):
    lo, hi = float(min(cutoff)), float(max(cutoff))
    lo, hi = max(0.0, lo), min(1.0, hi)
    if norm_type == 'quartile':
        lo, hi = min(lo, 0.24), max(hi, 0.76)
    else:
        lo, hi = min(lo, 0.09), max(hi, 0.91)
    return lo, hi


class HistogramNormalisationLayerPallas:
    """JAX/Pallas re-implementation of the forward pass (array input path)."""

    def __init__(self, image_name, modalities, norm_type='percentile',
                 cutoff=(0.05, 0.95), name='hist_norm'):
        assert norm_type == 'percentile'
        self.image_name = image_name
        self.modalities = list(modalities)
        self.norm_type = norm_type
        self.cutoff = _standardise_cutoff(cutoff, norm_type)
        self.name = name
        # Deterministic synthetic reference mapping (13 landmarks / modality);
        # stands in for read_mapping_file(histogram_ref_file.txt).
        self.mapping = {}
        for i, mod in enumerate(self.modalities):
            base = np.linspace(0.0, 100.0, 13, dtype=np.float32)
            self.mapping[mod] = base * (1.0 + 0.05 * i) + 2.0 * i

    # percentile fractions used by __compute_percentiles
    def _perc_fracs(self):
        lo, hi = self.cutoff
        return np.array([lo, 0.10, 0.20, 0.25, 0.30, 0.40, 0.50,
                         0.60, 0.70, 0.75, 0.80, 0.90, hi], dtype=np.float32)

    def _affine_params(self, image):
        """image: [X,Y,Z,T,M] -> (bounds [M,9], slopes [M,10], icpts [M,10])."""
        M = image.shape[-1]
        x2 = image.reshape(-1, M)                                        # [Npix, M]
        # TODO(synk): a non-trivial boolean foreground mask would need a masked
        # percentile; the module default mask is all-ones, so percentiles run
        # over all voxels.
        q13 = 100.0 * self._perc_fracs()
        # Fold min/max (0th / 100th percentiles) into the SAME sort so the
        # all-zero-modality flag needs no dedicated full-volume jnp.any pass.
        q = jnp.concatenate([jnp.zeros((1,), jnp.float32),
                             jnp.asarray(q13, jnp.float32),
                             jnp.full((1,), 100.0, jnp.float32)])
        perc_all = jnp.percentile(x2, q, axis=0).T                       # [M, 15]
        mod_min = perc_all[:, 0]                                         # [M]
        mod_max = perc_all[:, -1]                                        # [M]
        perc = perc_all[:, 1:-1]                                         # [M, 13]

        range_perc = perc[:, _RANGE_TO_USE]                              # [M, 11]
        mapping = jnp.stack(
            [jnp.asarray(self.mapping[mod], jnp.float32) for mod in
             self.modalities[:M]], axis=0)                               # [M, 13]
        range_map = mapping[:, _RANGE_TO_USE]                            # [M, 11]

        diff_map = range_map[:, 1:] - range_map[:, :-1]                  # [M, 10]
        diff_perc = range_perc[:, 1:] - range_perc[:, :-1]               # [M, 10]
        diff_perc = jnp.where(diff_perc == 0.0, jnp.inf, diff_perc)
        slopes = diff_map / diff_perc                                    # [M, 10]
        icpts = range_map[:, :-1] - slopes * range_perc[:, :-1]          # [M, 10]
        bounds = range_perc[:, 1:-1]                                     # [M, 9]

        # Fold the "skip modalities that are entirely zero" rule into the
        # affine table (identity map).  all-zero  <=>  min == max == 0.
        all_zero = (mod_min == 0.0) & (mod_max == 0.0)                   # [M]
        slopes = jnp.where(all_zero[:, None], 1.0, slopes)
        icpts = jnp.where(all_zero[:, None], 0.0, icpts)
        return (bounds.astype(jnp.float32), slopes.astype(jnp.float32),
                icpts.astype(jnp.float32))

    def _lane_coefficients(self, image):
        """Packed per-lane affine table [32, W] for the interleaved layout."""
        M = image.shape[-1]
        W = _lane_width(M)
        bounds, slopes, icpts = self._affine_params(image)
        lane_mod = jnp.arange(W, dtype=jnp.int32) % M                    # [W]
        coef = jnp.concatenate([
            jnp.take(slopes.T, lane_mod, axis=1),                        # rows  0..9
            jnp.take(icpts.T, lane_mod, axis=1),                         # rows 10..19
            jnp.take(bounds.T, lane_mod, axis=1),                        # rows 20..28
            jnp.zeros((_COEF_ROWS - 2 * _NUM_BINS - _NUM_BOUNDS, W),
                      jnp.float32),                                      # pad rows
        ], axis=0)
        return coef                                                      # [32, W]

    def forward(self, image, mask=None):
        image = jnp.asarray(image, jnp.float32)
        assert image.ndim == 5
        M = image.shape[-1]
        assert M <= len(self.modalities)

        coef = self._lane_coefficients(image)                            # [32, W]
        W = _lane_width(M)
        total = int(np.prod(image.shape))
        rows_exact, rem = divmod(total, W)

        if rem == 0:
            # Zero-copy path: free reshape, no pad, no output slice.  Row-count
            # raggedness vs block_rows is handled by Pallas (masked writeback).
            x2d = image.reshape(rows_exact, W)
            rows = rows_exact
        else:
            # TODO(synk): this rare path still pays one full-volume pad copy
            # (and one output slice); avoiding it would need a manual-DMA
            # kernel over the flat 1-D buffer.
            rows = pl.cdiv(pl.cdiv(total, W), _ROW_MIN) * _ROW_MIN
            flat = jnp.pad(image.reshape(-1), (0, rows * W - total))
            x2d = flat.reshape(rows, W)

        block_rows = _pick_block_rows(rows, W)
        y2d = _piecewise_linear_pallas(x2d, coef, block_rows)

        if rem == 0:
            normed = y2d.reshape(image.shape)
        else:
            normed = y2d.reshape(-1)[:total].reshape(image.shape)

        if mask is None:
            # Zero-cost all-ones mask: host-side broadcast view, no HBM write.
            mask = np.broadcast_to(np.bool_(True), image.shape)
        return normed, mask

    # pure-JAX reference (no Pallas) sharing the same param construction
    def forward_reference(self, image):
        image = jnp.asarray(image, jnp.float32)
        M = image.shape[-1]
        bounds, slopes, icpts = self._affine_params(image)
        x2 = image.reshape(-1, M)                                        # [Npix, M]

        def per_mod(x, b, s, ic):
            bin_id = jnp.searchsorted(b, x, side='right')  # == np.digitize(right=False)
            return s[bin_id] * x + ic[bin_id]

        y = jax.vmap(per_mod, in_axes=(1, 0, 0, 0), out_axes=1)(
            x2, bounds, slopes, icpts)
        return y.reshape(image.shape)


# ----------------------------------- demo --------------------------------------
if __name__ == "__main__":
    key = jax.random.PRNGKey(0)
    layer = HistogramNormalisationLayerPallas(
        image_name='image', modalities=['T1', 'T2'],
        norm_type='percentile', cutoff=(0.05, 0.95))

    # 1) main shape — zero-copy path, even grid (splits across v7x TCs)
    X, Y, Z, T, M = 16, 16, 8, 1, 2
    k0, k1, k2 = jax.random.split(key, 3)
    image = jax.random.uniform(k0, (X, Y, Z, T, M),
                               dtype=jnp.float32, minval=0.0, maxval=255.0)
    normed, out_mask = layer.forward(image)
    normed = jax.block_until_ready(normed)
    ref = jax.block_until_ready(layer.forward_reference(image))
    np.testing.assert_allclose(np.asarray(normed), np.asarray(ref),
                               rtol=1e-5, atol=1e-3)
    assert normed.shape == image.shape and normed.dtype == jnp.float32
    assert out_mask.shape == image.shape and bool(out_mask.dtype == jnp.bool_)

    # 2) ragged trailing grid block (rows % block_rows != 0), still zero-copy
    image_r = jax.random.uniform(k1, (16, 10, 16, 1, 2),
                                 dtype=jnp.float32, minval=0.0, maxval=255.0)
    normed_r, _ = layer.forward(image_r)
    normed_r = jax.block_until_ready(normed_r)
    ref_r = jax.block_until_ready(layer.forward_reference(image_r))
    np.testing.assert_allclose(np.asarray(normed_r), np.asarray(ref_r),
                               rtol=1e-5, atol=1e-3)

    # 3) total % W != 0 fallback (pad path) still correct
    image_t = jax.random.uniform(k2, (7, 9, 5, 1, 2),
                                 dtype=jnp.float32, minval=0.0, maxval=255.0)
    normed_t, _ = layer.forward(image_t)
    normed_t = jax.block_until_ready(normed_t)
    ref_t = jax.block_until_ready(layer.forward_reference(image_t))
    np.testing.assert_allclose(np.asarray(normed_t), np.asarray(ref_t),
                               rtol=1e-5, atol=1e-3)

    # 4) all-zero modality must pass through unchanged (NiftyNet "continue" rule)
    image_z = image.at[..., 1].set(0.0)
    normed_z, _ = layer.forward(image_z)
    normed_z = jax.block_until_ready(normed_z)
    np.testing.assert_allclose(np.asarray(normed_z[..., 1]),
                               np.asarray(image_z[..., 1]), rtol=0, atol=0)

    print("KERNEL_OK")
</pallas_src>

<mosaic_0001>
module attributes {stable_mosaic.version = 11 : i64} {
  func.func @_hist_norm_kernel(%arg0: i32, %arg1: memref<32x128xf32, #tpu.memory_space<vmem>>, %arg2: memref<16x128xf32, #tpu.memory_space<vmem>>, %arg3: memref<16x128xf32, #tpu.memory_space<vmem>>) attributes {dimension_semantics = [#tpu.dimension_semantics<parallel>], iteration_bounds = array<i64: 2>, scalar_prefetch = 0 : i64, scratch_operands = 0 : i64, tpu.core_type = #tpu.core_type<tc>, window_params = [{pipeline_mode = #tpu.pipeline_mode<synchronous>, transform_indices = @transform_0, window_bounds = array<i64: 32, 128>}, {transform_indices = @transform_1, window_bounds = array<i64: 16, 128>}, {transform_indices = @transform_2, window_bounds = array<i64: 16, 128>}]} {
    %c0 = arith.constant 0 : index
    %c0_0 = arith.constant 0 : index
    %0 = vector.load %arg2[%c0, %c0_0] : memref<16x128xf32, #tpu.memory_space<vmem>>, vector<16x128xf32>
    %c0_1 = arith.constant 0 : index
    %c0_2 = arith.constant 0 : index
    %1 = vector.load %arg1[%c0_1, %c0_2] : memref<32x128xf32, #tpu.memory_space<vmem>>, vector<1x128xf32>
    %c1 = arith.constant 1 : index
    %c0_3 = arith.constant 0 : index
    %2 = vector.load %arg1[%c1, %c0_3] : memref<32x128xf32, #tpu.memory_space<vmem>>, vector<1x128xf32>
    %c2 = arith.constant 2 : index
    %c0_4 = arith.constant 0 : index
    %3 = vector.load %arg1[%c2, %c0_4] : memref<32x128xf32, #tpu.memory_space<vmem>>, vector<1x128xf32>
    %c3 = arith.constant 3 : index
    %c0_5 = arith.constant 0 : index
    %4 = vector.load %arg1[%c3, %c0_5] : memref<32x128xf32, #tpu.memory_space<vmem>>, vector<1x128xf32>
    %c4 = arith.constant 4 : index
    %c0_6 = arith.constant 0 : index
    %5 = vector.load %arg1[%c4, %c0_6] : memref<32x128xf32, #tpu.memory_space<vmem>>, vector<1x128xf32>
    %c5 = arith.constant 5 : index
    %c0_7 = arith.constant 0 : index
    %6 = vector.load %arg1[%c5, %c0_7] : memref<32x128xf32, #tpu.memory_space<vmem>>, vector<1x128xf32>
    %c6 = arith.constant 6 : index
    %c0_8 = arith.constant 0 : index
    %7 = vector.load %arg1[%c6, %c0_8] : memref<32x128xf32, #tpu.memory_space<vmem>>, vector<1x128xf32>
    %c7 = arith.constant 7 : index
    %c0_9 = arith.constant 0 : index
    %8 = vector.load %arg1[%c7, %c0_9] : memref<32x128xf32, #tpu.memory_space<vmem>>, vector<1x128xf32>
    %c8 = arith.constant 8 : index
    %c0_10 = arith.constant 0 : index
    %9 = vector.load %arg1[%c8, %c0_10] : memref<32x128xf32, #tpu.memory_space<vmem>>, vector<1x128xf32>
    %c9 = arith.constant 9 : index
    %c0_11 = arith.constant 0 : index
    %10 = vector.load %arg1[%c9, %c0_11] : memref<32x128xf32, #tpu.memory_space<vmem>>, vector<1x128xf32>
    %c10 = arith.constant 10 : index
    %c0_12 = arith.constant 0 : index
    %11 = vector.load %arg1[%c10, %c0_12] : memref<32x128xf32, #tpu.memory_space<vmem>>, vector<1x128xf32>
    %c11 = arith.constant 11 : index
    %c0_13 = arith.constant 0 : index
    %12 = vector.load %arg1[%c11, %c0_13] : memref<32x128xf32, #tpu.memory_space<vmem>>, vector<1x128xf32>
    %c12 = arith.constant 12 : index
    %c0_14 = arith.constant 0 : index
    %13 = vector.load %arg1[%c12, %c0_14] : memref<32x128xf32, #tpu.memory_space<vmem>>, vector<1x128xf32>
    %c13 = arith.constant 13 : index
    %c0_15 = arith.constant 0 : index
    %14 = vector.load %arg1[%c13, %c0_15] : memref<32x128xf32, #tpu.memory_space<vmem>>, vector<1x128xf32>
    %c14 = arith.constant 14 : index
    %c0_16 = arith.constant 0 : index
    %15 = vector.load %arg1[%c14, %c0_16] : memref<32x128xf32, #tpu.memory_space<vmem>>, vector<1x128xf32>
    %c15 = arith.constant 15 : index
    %c0_17 = arith.constant 0 : index
    %16 = vector.load %arg1[%c15, %c0_17] : memref<32x128xf32, #tpu.memory_space<vmem>>, vector<1x128xf32>
    %c16 = arith.constant 16 : index
    %c0_18 = arith.constant 0 : index
    %17 = vector.load %arg1[%c16, %c0_18] : memref<32x128xf32, #tpu.memory_space<vmem>>, vector<1x128xf32>
    %c17 = arith.constant 17 : index
    %c0_19 = arith.constant 0 : index
    %18 = vector.load %arg1[%c17, %c0_19] : memref<32x128xf32, #tpu.memory_space<vmem>>, vector<1x128xf32>
    %c18 = arith.constant 18 : index
    %c0_20 = arith.constant 0 : index
    %19 = vector.load %arg1[%c18, %c0_20] : memref<32x128xf32, #tpu.memory_space<vmem>>, vector<1x128xf32>
    %c19 = arith.constant 19 : index
    %c0_21 = arith.constant 0 : index
    %20 = vector.load %arg1[%c19, %c0_21] : memref<32x128xf32, #tpu.memory_space<vmem>>, vector<1x128xf32>
    %c20 = arith.constant 20 : index
    %c0_22 = arith.constant 0 : index
    %21 = vector.load %arg1[%c20, %c0_22] : memref<32x128xf32, #tpu.memory_space<vmem>>, vector<1x128xf32>
    %c21 = arith.constant 21 : index
    %c0_23 = arith.constant 0 : index
    %22 = vector.load %arg1[%c21, %c0_23] : memref<32x128xf32, #tpu.memory_space<vmem>>, vector<1x128xf32>
    %c22 = arith.constant 22 : index
    %c0_24 = arith.constant 0 : index
    %23 = vector.load %arg1[%c22, %c0_24] : memref<32x128xf32, #tpu.memory_space<vmem>>, vector<1x128xf32>
    %c23 = arith.constant 23 : index
    %c0_25 = arith.constant 0 : index
    %24 = vector.load %arg1[%c23, %c0_25] : memref<32x128xf32, #tpu.memory_space<vmem>>, vector<1x128xf32>
    %c24 = arith.constant 24 : index
    %c0_26 = arith.constant 0 : index
    %25 = vector.load %arg1[%c24, %c0_26] : memref<32x128xf32, #tpu.memory_space<vmem>>, vector<1x128xf32>
    %c25 = arith.constant 25 : index
    %c0_27 = arith.constant 0 : index
    %26 = vector.load %arg1[%c25, %c0_27] : memref<32x128xf32, #tpu.memory_space<vmem>>, vector<1x128xf32>
    %c26 = arith.constant 26 : index
    %c0_28 = arith.constant 0 : index
    %27 = vector.load %arg1[%c26, %c0_28] : memref<32x128xf32, #tpu.memory_space<vmem>>, vector<1x128xf32>
    %c27 = arith.constant 27 : index
    %c0_29 = arith.constant 0 : index
    %28 = vector.load %arg1[%c27, %c0_29] : memref<32x128xf32, #tpu.memory_space<vmem>>, vector<1x128xf32>
    %c28 = arith.constant 28 : index
    %c0_30 = arith.constant 0 : index
    %29 = vector.load %arg1[%c28, %c0_30] : memref<32x128xf32, #tpu.memory_space<vmem>>, vector<1x128xf32>
    %30 = vector.broadcast %21 : vector<1x128xf32> to vector<16x128xf32>
    %31 = arith.cmpf oge, %0, %30 : vector<16x128xf32>
    %32 = vector.shape_cast %2 : vector<1x128xf32> to vector<1x128xf32>
    %33 = vector.broadcast %32 : vector<1x128xf32> to vector<16x128xf32>
    %34 = vector.shape_cast %1 : vector<1x128xf32> to vector<1x128xf32>
    %35 = vector.broadcast %34 : vector<1x128xf32> to vector<16x128xf32>
    %36 = arith.select %31, %33, %35 : vector<16x128xi1>, vector<16x128xf32>
    %37 = vector.shape_cast %12 : vector<1x128xf32> to vector<1x128xf32>
    %38 = vector.broadcast %37 : vector<1x128xf32> to vector<16x128xf32>
    %39 = vector.shape_cast %11 : vector<1x128xf32> to vector<1x128xf32>
    %40 = vector.broadcast %39 : vector<1x128xf32> to vector<16x128xf32>
    %41 = arith.select %31, %38, %40 : vector<16x128xi1>, vector<16x128xf32>
    %42 = vector.broadcast %22 : vector<1x128xf32> to vector<16x128xf32>
    %43 = arith.cmpf oge, %0, %42 : vector<16x128xf32>
    %44 = vector.shape_cast %3 : vector<1x128xf32> to vector<1x128xf32>
    %45 = vector.broadcast %44 : vector<1x128xf32> to vector<16x128xf32>
    %46 = arith.select %43, %45, %36 : vector<16x128xi1>, vector<16x128xf32>
    %47 = vector.shape_cast %13 : vector<1x128xf32> to vector<1x128xf32>
    %48 = vector.broadcast %47 : vector<1x128xf32> to vector<16x128xf32>
    %49 = arith.select %43, %48, %41 : vector<16x128xi1>, vector<16x128xf32>
    %50 = vector.broadcast %23 : vector<1x128xf32> to vector<16x128xf32>
    %51 = arith.cmpf oge, %0, %50 : vector<16x128xf32>
    %52 = vector.shape_cast %4 : vector<1x128xf32> to vector<1x128xf32>
    %53 = vector.broadcast %52 : vector<1x128xf32> to vector<16x128xf32>
    %54 = arith.select %51, %53, %46 : vector<16x128xi1>, vector<16x128xf32>
    %55 = vector.shape_cast %14 : vector<1x128xf32> to vector<1x128xf32>
    %56 = vector.broadcast %55 : vector<1x128xf32> to vector<16x128xf32>
    %57 = arith.select %51, %56, %49 : vector<16x128xi1>, vector<16x128xf32>
    %58 = vector.broadcast %24 : vector<1x128xf32> to vector<16x128xf32>
    %59 = arith.cmpf oge, %0, %58 : vector<16x128xf32>
    %60 = vector.shape_cast %5 : vector<1x128xf32> to vector<1x128xf32>
    %61 = vector.broadcast %60 : vector<1x128xf32> to vector<16x128xf32>
    %62 = arith.select %59, %61, %54 : vector<16x128xi1>, vector<16x128xf32>
    %63 = vector.shape_cast %15 : vector<1x128xf32> to vector<1x128xf32>
    %64 = vector.broadcast %63 : vector<1x128xf32> to vector<16x128xf32>
    %65 = arith.select %59, %64, %57 : vector<16x128xi1>, vector<16x128xf32>
    %66 = vector.broadcast %25 : vector<1x128xf32> to vector<16x128xf32>
    %67 = arith.cmpf oge, %0, %66 : vector<16x128xf32>
    %68 = vector.shape_cast %6 : vector<1x128xf32> to vector<1x128xf32>
    %69 = vector.broadcast %68 : vector<1x128xf32> to vector<16x128xf32>
    %70 = arith.select %67, %69, %62 : vector<16x128xi1>, vector<16x128xf32>
    %71 = vector.shape_cast %16 : vector<1x128xf32> to vector<1x128xf32>
    %72 = vector.broadcast %71 : vector<1x128xf32> to vector<16x128xf32>
    %73 = arith.select %67, %72, %65 : vector<16x128xi1>, vector<16x128xf32>
    %74 = vector.broadcast %26 : vector<1x128xf32> to vector<16x128xf32>
    %75 = arith.cmpf oge, %0, %74 : vector<16x128xf32>
    %76 = vector.shape_cast %7 : vector<1x128xf32> to vector<1x128xf32>
    %77 = vector.broadcast %76 : vector<1x128xf32> to vector<16x128xf32>
    %78 = arith.select %75, %77, %70 : vector<16x128xi1>, vector<16x128xf32>
    %79 = vector.shape_cast %17 : vector<1x128xf32> to vector<1x128xf32>
    %80 = vector.broadcast %79 : vector<1x128xf32> to vector<16x128xf32>
    %81 = arith.select %75, %80, %73 : vector<16x128xi1>, vector<16x128xf32>
    %82 = vector.broadcast %27 : vector<1x128xf32> to vector<16x128xf32>
    %83 = arith.cmpf oge, %0, %82 : vector<16x128xf32>
    %84 = vector.shape_cast %8 : vector<1x128xf32> to vector<1x128xf32>
    %85 = vector.broadcast %84 : vector<1x128xf32> to vector<16x128xf32>
    %86 = arith.select %83, %85, %78 : vector<16x128xi1>, vector<16x128xf32>
    %87 = vector.shape_cast %18 : vector<1x128xf32> to vector<1x128xf32>
    %88 = vector.broadcast %87 : vector<1x128xf32> to vector<16x128xf32>
    %89 = arith.select %83, %88, %81 : vector<16x128xi1>, vector<16x128xf32>
    %90 = vector.broadcast %28 : vector<1x128xf32> to vector<16x128xf32>
    %91 = arith.cmpf oge, %0, %90 : vector<16x128xf32>
    %92 = vector.shape_cast %9 : vector<1x128xf32> to vector<1x128xf32>
    %93 = vector.broadcast %92 : vector<1x128xf32> to vector<16x128xf32>
    %94 = arith.select %91, %93, %86 : vector<16x128xi1>, vector<16x128xf32>
    %95 = vector.shape_cast %19 : vector<1x128xf32> to vector<1x128xf32>
    %96 = vector.broadcast %95 : vector<1x128xf32> to vector<16x128xf32>
    %97 = arith.select %91, %96, %89 : vector<16x128xi1>, vector<16x128xf32>
    %98 = vector.broadcast %29 : vector<1x128xf32> to vector<16x128xf32>
    %99 = arith.cmpf oge, %0, %98 : vector<16x128xf32>
    %100 = vector.shape_cast %10 : vector<1x128xf32> to vector<1x128xf32>
    %101 = vector.broadcast %100 : vector<1x128xf32> to vector<16x128xf32>
    %102 = arith.select %99, %101, %94 : vector<16x128xi1>, vector<16x128xf32>
    %103 = vector.shape_cast %20 : vector<1x128xf32> to vector<1x128xf32>
    %104 = vector.broadcast %103 : vector<1x128xf32> to vector<16x128xf32>
    %105 = arith.select %99, %104, %97 : vector<16x128xi1>, vector<16x128xf32>
    %106 = arith.mulf %102, %0 : vector<16x128xf32>
    %107 = arith.addf %106, %105 : vector<16x128xf32>
    %c0_31 = arith.constant 0 : index
    %c0_32 = arith.constant 0 : index
    %108 = vector.load %arg3[%c0_31, %c0_32] : memref<16x128xf32, #tpu.memory_space<vmem>>, vector<16x128xf32>
    tpu.vector_store %arg3[%c0_31, %c0_32], %107 {strides = array<i32>} : memref<16x128xf32, #tpu.memory_space<vmem>>, vector<16x128xf32>,
    return
  }
  func.func @transform_0(%arg0: i32) -> (i32, i32) {
    %c0_i32 = arith.constant 0 : i32
    %c0_i32_0 = arith.constant 0 : i32
    %c0_i32_1 = arith.constant 0 : i32
    return %c0_i32, %c0_i32_0 : i32, i32
  }
  func.func @transform_1(%arg0: i32) -> (i32, i32) {
    %c0_i32 = arith.constant 0 : i32
    %c0_i32_0 = arith.constant 0 : i32
    return %arg0, %c0_i32 : i32, i32
  }
  func.func @transform_2(%arg0: i32) -> (i32, i32) {
    %c0_i32 = arith.constant 0 : i32
    %c0_i32_0 = arith.constant 0 : i32
    return %arg0, %c0_i32 : i32, i32
  }
}

</mosaic_0001>

<bundles_post_ra>
// kernel: tpu_custom_call.1
= control target key start
LH: loop header
LB: loop body
LE: loop exit
PB: predicated region body
PF: predicated region fallthrough
CT: control target
= control target key end

     0   :  { %7 = vsyncpa [#allocation3], 0  ;;  %s1024_s0 = inlined_call_operand.hbm [shape: f32[32,128], index: 0, kind: input, shape index: {}]   ;;  %s1025_s1 = inlined_call_operand.hbm [shape: f32[32,128], index: 1, kind: input, shape index: {}]   ;;  %s1026_s2 = inlined_call_operand.hbm [shape: f32[32,128], index: 2, kind: output, shape index: {}]  }
   0x1   :  { %8 = vsyncpa [#allocation6], 0 }
   0x2   :  { %10 = vsyncpa [#allocation6 + $0x1], 0 }
   0x3   :  { %11 = vsyncpa [#allocation4], 0 }
   0x4   :  { %13 = vsyncpa [#allocation4 + $0x1], 0  ;;  %s745_s9 = smov 0   ;;  %s747_s10 = smov 0  }
   0x5   :  { %s749_s11 = smov 0   ;;  %s751_s12 = smov 0  }
   0x6 LB: > { %s766_s13 = sadd.s32 4294967295, %s721_s12   ;;  %s485_s14 = sadd.s32 4294967294, %s721_s12   ;;  %s721_s12 = sphi %s751_s12, %s1046_s12   ;;  %s717_s11 = sphi %s749_s11, %s1045_s11   ;;  %s713_s10 = sphi %s747_s10, %s1044_s10   ;;  %s709_s9 = sphi %s745_s9, %s1043_s9  }
   0x7   : > { %p60_p0 = scmp.ne.s32.totalorder %s713_s10, %s709_s9  ;;  %p1027_p1 = scmp.eq.s32.totalorder %s766_s13, 0 }
   0x8   : > { %p90_p3 = scmp.eq.s32.totalorder %s485_s14, 1  ;;  %p486_p5 = scmp.ge.s32.totalorder %s721_s12, 1 }
   0x9   : > { %p775_p4 = por %p1027_p1, %p60_p0  ;;  %p97_p7 = scmp.lt.s32.totalorder %s721_s12, 3 }
   0xa   : > { %p780_p6 = por %p90_p3, %p60_p0  ;;  %s723_s18 = smov [#allocation2]  }
   0xb   : > { %s1030_s15 = scalar_select %p775_p4, 1, 0 }
   0xc   : > { %s1031_s16 = scalar_select %p780_p6, 1, 0 }
   0xd   : > { %p785_p8 = pnand %p486_p5, %p97_p7  ;;  %s109_s19 = sshll.u32 %s723_s18, 4  ;;  %s789_s19 = int_to_ptr.vmem [resolvable:$true] %s109_s19 }
   0xe   : > { %s801_s21 = sadd.s32 1, %s721_s12   ;;  %s47_s22 = sadd.s32 1, %s717_s11 }
   0xf   : > { %s1032_s17 = scalar_select %p785_p8, 1, 0 }
  0x10   : > { %p540_p9 = pneg %p785_p8  ;;  %s44_s23 = ssub.s32 %s721_s12, %s801_s21 }
  0x11   : > { %s593_s26 = scalar_lea.hbm %s1024_s0, 512 }
  0x12   : > { %p796_p11 = pnand %p540_p9, %p1027_p1  ;;  %p594_p12 = scmp.ne.s32.totalorder %s1024_s0, %s593_s26 }
  0x13   : > { %p600_p5 = scmp.lt.u32.totalorder %s593_s26, %s1024_s0 }
  0x14   : > { %p595_p13 = pneg %p796_p11 }
  0x16   : > { %p596_p0 = pnand %p595_p13, %p594_p12 }
  0x18   : > { %p597_p3 = pneg %p596_p0 }
  0x1a   : > { %p602_p7 = pnand %p600_p5, %p597_p3 }
  0x1c   : > { %605 = shalt.err (!%p602_p7)
}
  0x1d   : > { %s606_s3 = scalar_lea.vmem %s789_s19, 512  ;;  %p614_p2 = scmp.lt.s32.totalorder %s789_s19, %s789_s19 }
  0x1e   : > { %p607_p9 = scmp.ne.s32.totalorder %s789_s19, %s606_s3  ;;  %p615_p6 = scmp.lt.s32.totalorder %s606_s3, %s606_s3 }
  0x20   : > { %p609_p10 = pnand %p607_p9, %p595_p13  ;;  %p616_p4 = por %p615_p6, %p614_p2 }
  0x22   : > { %p610_p1 = pneg %p609_p10 }
  0x24   : > { %p617_p8 = pnand %p616_p4, %p610_p1 }
  0x26   : > { %620 = shalt.err (!%p617_p8)
}
  0x27   : > { %s724_s4 = smov 128   ;;  %s725_s5 = smov 8  }
  0x28   : > { %543 = dma.hbm_to_vmem [thread:$0]  (!%p796_p11), %s1024_s0, 512, %s789_s19, [#allocation3], %s724_s4, %s724_s4, %s725_s5  }
  0x29   : > { %p45_p1 = scmp.eq.s32.totalorder %s44_s23, 0  ;;  %p54_p2 = scmp.ne.s32.totalorder %s717_s11, %s713_s10 }
  0x2a   : > { %p55_p4 = scmp.eq.s32.totalorder %s721_s12, 0  ;;  %p553_p6 = scmp.lt.s32.totalorder %s721_s12, 2 }
  0x2b   : > { %s835_s8 = scalar_select %p45_p1, %s717_s11, %s47_s22  }
  0x2c   : > { %p56_p8 = por %p55_p4, %p54_p2  ;;  %p1034_p10 = scmp.eq.s32.totalorder %s766_s13, 1 }
  0x2d   : > { %s123_s18 = sand.u32 1, %s717_s11   ;;  %s530_s20 = sshll.u32 %s721_s12, 8 }
  0x2e   : > { %p839_p12 = por %p1034_p10, %p54_p2  ;;  %s489_s24 = sshll.u32 %s123_s18, 4 }
  0x2f   : > { %s848_s27 = scalar_lea.hbm %s1025_s1, %s530_s20  ;;  %s127_s19 = scalar_lea.vmem [#allocation5], %s489_s24 }
  0x30   : > { %s134_s22 = sshll.u32 %s127_s19, 4  ;;  %p850_p11 = pnand %p553_p6, %p56_p8  ;;  %s854_s22 = int_to_ptr.vmem [resolvable:$true] %s134_s22 }
  0x31   : > { %s856_s28 = scalar_lea.sflag [#allocation6], %s123_s18  ;;  %s621_s29 = scalar_lea.hbm %s848_s27, 256 }
  0x32   : > { %p622_p13 = scmp.ne.s32.totalorder %s848_s27, %s621_s29  ;;  %p623_p0 = pneg %p850_p11 }
  0x33   : > { %s626_s6 = scalar_lea.hbm %s1025_s1, 512  ;;  %p627_p7 = scmp.lt.u32.totalorder %s848_s27, %s1025_s1 }
  0x34   : > { %p624_p3 = pnand %p623_p0, %p622_p13  ;;  %p628_p9 = scmp.lt.u32.totalorder %s626_s6, %s621_s29 }
  0x35   : > { %p630_p2 = scmp.lt.u32.totalorder %s621_s29, %s848_s27 }
  0x36   : > { %p625_p5 = pneg %p624_p3  ;;  %p629_p1 = por %p628_p9, %p627_p7 }
  0x38   : > { %p631_p4 = por %p630_p2, %p629_p1 }
  0x3a   : > { %p632_p6 = pnand %p631_p4, %p625_p5 }
  0x3c   : > { %635 = shalt.err (!%p632_p6)
}
  0x3d   : > { %s636_s18 = scalar_lea.vmem %s854_s22, 256  ;;  %s726_s24 = smov [#allocation5]  }
  0x3e   : > { %p637_p8 = scmp.ne.s32.totalorder %s854_s22, %s636_s18  ;;  %s641_s25 = sshll.u32 %s726_s24, 4  ;;  %s642_s25 = int_to_ptr.vmem [resolvable:$false] %s641_s25 }
  0x3f   : > { %s643_s26 = scalar_lea.vmem %s642_s25, 512  ;;  %p644_p3 = scmp.lt.s32.totalorder %s854_s22, %s642_s25 }
  0x40   : > { %p639_p10 = pnand %p637_p8, %p623_p0  ;;  %p645_p7 = scmp.lt.s32.totalorder %s643_s26, %s636_s18 }
  0x42   : > { %p640_p13 = pneg %p639_p10  ;;  %p646_p9 = por %p645_p7, %p644_p3 }
  0x44   : > { %p647_p1 = pnand %p646_p9, %p640_p13 }
  0x46   : > { %650 = shalt.err (!%p647_p1)
}
  0x47   : > { %547 = dma.hbm_to_vmem [thread:$0]  (!%p850_p11), %s848_s27, 256, %s854_s22, %s856_s28, %s724_s4, %s724_s4, %s725_s5  }
  0x48   : > { %p1037_p0 = scmp.ne.s32.totalorder %s1032_s17, 0 }
  0x49   : > { %p1038_p5 = scmp.eq.s32.totalorder (!%p1037_p0), %s766_s13, 0 }
  0x4a   : > { %146 = sbr.rel (%p1037_p0) target bundleno = 126 (0x7e), region = 28 }
  0x51   : > { %696 = dma.done.wait (%p1038_p5), [#allocation3], 512   ;;  %p1039_p2 = pmov %p1038_p5 }
  0x52   : > { %s894_s19 = sand.u32 1, %s713_s10   ;;  %p1040_p11 = scmp.ne.s32.totalorder %s1030_s15, 0 }
  0x53   : > { %698 = vsyncadd (%p1039_p2), [#allocation3], 4294966784  ;;  %s494_s23 = sshll.u32 %s894_s19, 4  ;;  %s153_s29 = scalar_lea.sflag [#allocation6], %s894_s19 }
  0x54   : > { %s900_s4 = scalar_lea.vmem [#allocation5], %s494_s23 }
  0x55   : > { %700 = dma.done.wait (%p1040_p11), %s153_s29, 256  }
  0x56   : > { %702 = vsyncadd (%p1040_p11), %s153_s29, 4294967040  ;;  %v907_v0 = vld [vmem:[%s900_s4] sm:$0xff]  ;;  %v500_v4 = vld [vmem:[#allocation2 + $0xa] ss:$0 sm:$0xff]  ;;  %s176_s15 = scalar_lea.vmem [#allocation7], %s494_s23  ;;  %s531_s5 = sshll.u32 %s766_s13, 8 }
  0x57   : > { %v498_v1 = vld [vmem:[#allocation2] ss:$0 sm:$0xff]  ;;  %v497_v2 = vld [vmem:[#allocation2 + $0x1] ss:$0 sm:$0xff]  ;;  %v502_v3 = vld [vmem:[#allocation2 + $0x2] ss:$0 sm:$0xff]  ;;  %s980_s28 = scalar_lea.hbm %s1026_s2, %s531_s5 }
  0x58   : > { %v505_v5 = vld [vmem:[#allocation2 + $0x3] ss:$0 sm:$0xff]  ;;  %v499_v6 = vld [vmem:[#allocation2 + $0xb] ss:$0 sm:$0xff]  ;;  %v503_v7 = vld [vmem:[#allocation2 + $0xc] ss:$0 sm:$0xff] }
  0x59   : > { %v506_v8 = vld [vmem:[#allocation2 + $0xd] ss:$0 sm:$0xff]  ;;  %v508_v9 = vld [vmem:[#allocation2 + $0x4] ss:$0 sm:$0xff]  ;;  %v509_v10 = vld [vmem:[#allocation2 + $0xe] ss:$0 sm:$0xff] }
  0x5a   : > { %v496_v11 = vld [vmem:[#allocation2 + $0x14] ss:$0 sm:$0xff]  ;;  %v501_v12 = vld [vmem:[#allocation2 + $0x15] ss:$0 sm:$0xff]  ;;  %v504_v13 = vld [vmem:[#allocation2 + $0x16] ss:$0 sm:$0xff] }
  0x5b   : > { %v507_v14 = vld [vmem:[#allocation2 + $0x17] ss:$0 sm:$0xff]  ;;  %v510_v15 = vld [vmem:[#allocation2 + $0x18] ss:$0 sm:$0xff]  ;;  %v909_v16 = vld [vmem:[#allocation2 + $0x19] ss:$0 sm:$0xff]  ;;  %vm214_vm0 = vcmp.ge.f32.partialorder %v907_v0, %v496_v11  ;;  %vm240_vm1 = vcmp.ge.f32.partialorder %v907_v0, %v501_v12  ;;  %vm258_vm2 = vcmp.ge.f32.partialorder %v907_v0, %v504_v13 }
  0x5c   : > { %v914_v17 = vld [vmem:[#allocation2 + $0x1a] ss:$0 sm:$0xff]  ;;  %v916_v18 = vld [vmem:[#allocation2 + $0x1b] ss:$0 sm:$0xff]  ;;  %v918_v19 = vld [vmem:[#allocation2 + $0x1c] ss:$0 sm:$0xff]  ;;  %v224_v20 = vsel %vm214_vm0, %v497_v2, %v498_v1  ;;  %v234_v21 = vsel %vm214_vm0, %v499_v6, %v500_v4  ;;  %vm276_vm3 = vcmp.ge.f32.partialorder %v907_v0, %v507_v14  ;;  %vm294_vm4 = vcmp.ge.f32.partialorder %v907_v0, %v510_v15 }
  0x5d   : > { %v511_v22 = vld [vmem:[#allocation2 + $0x5] ss:$0 sm:$0xff]  ;;  %v512_v23 = vld [vmem:[#allocation2 + $0xf] ss:$0 sm:$0xff]  ;;  %v246_v24 = vsel %vm240_vm1, %v502_v3, %v224_v20  ;;  %v252_v25 = vsel %vm240_vm1, %v503_v7, %v234_v21  ;;  %vm312_vm5 = vcmp.ge.f32.partialorder %v907_v0, %v909_v16  ;;  %vm330_vm6 = vcmp.ge.f32.partialorder %v907_v0, %v914_v17  ;;  %v514_v27 = vld [vmem:[#allocation2 + $0x6] ss:$0 sm:$0xff] }
  0x5e   : > { %v180_v26 = vld [vmem:[%s900_s4 + $0x8] sm:$0xff]  ;;  %v515_v28 = vld [vmem:[#allocation2 + $0x10] ss:$0 sm:$0xff]  ;;  %v264_v29 = vsel %vm258_vm2, %v505_v5, %v246_v24  ;;  %v270_v30 = vsel %vm258_vm2, %v506_v8, %v252_v25  ;;  %vm348_vm7 = vcmp.ge.f32.partialorder %v907_v0, %v916_v18  ;;  %vm366_vm8 = vcmp.ge.f32.partialorder %v907_v0, %v918_v19  ;;  %v517_v31 = vld [vmem:[#allocation2 + $0x7] ss:$0 sm:$0xff]  ;;  %s400_s17 = sshll.u32 %s176_s15, 4  ;;  %s975_s17 = int_to_ptr.vmem [resolvable:$true] %s400_s17 }
  0x5f   : > { %v518_v32 = vld [vmem:[#allocation2 + $0x11] ss:$0 sm:$0xff]  ;;  %v282_v33 = vsel %vm276_vm3, %v508_v9, %v264_v29  ;;  %v288_v34 = vsel %vm276_vm3, %v509_v10, %v270_v30  ;;  %vm215_vm9 = vcmp.ge.f32.partialorder %v180_v26, %v496_v11  ;;  %vm241_vm10 = vcmp.ge.f32.partialorder %v180_v26, %v501_v12  ;;  %v520_v35 = vld [vmem:[#allocation2 + $0x8] ss:$0 sm:$0xff]  ;;  %v521_v36 = vld [vmem:[#allocation2 + $0x12] ss:$0 sm:$0xff] }
  0x60   : > { %v300_v37 = vsel %vm294_vm4, %v511_v22, %v282_v33  ;;  %v306_v38 = vsel %vm294_vm4, %v512_v23, %v288_v34  ;;  %v225_v39 = vsel %vm215_vm9, %v497_v2, %v498_v1  ;;  %v235_v40 = vsel %vm215_vm9, %v499_v6, %v500_v4  ;;  %v523_v41 = vld [vmem:[#allocation2 + $0x9] ss:$0 sm:$0xff]  ;;  %v524_v42 = vld [vmem:[#allocation2 + $0x13] ss:$0 sm:$0xff]  ;;  %s387_s30 = scalar_lea.sflag [#allocation4], %s894_s19  ;;  %s651_s3 = scalar_lea.vmem %s975_s17, 256 }
  0x61   : > { %v318_v43 = vsel %vm312_vm5, %v514_v27, %v300_v37  ;;  %v324_v44 = vsel %vm312_vm5, %v515_v28, %v306_v38  ;;  %v247_v45 = vsel %vm241_vm10, %v502_v3, %v225_v39  ;;  %v253_v46 = vsel %vm241_vm10, %v503_v7, %v235_v40  ;;  %p652_p4 = scmp.ne.s32.totalorder %s975_s17, %s651_s3  ;;  %s727_s13 = smov [#allocation7]  }
  0x62   : > { %v336_v47 = vsel %vm330_vm6, %v517_v31, %v318_v43  ;;  %v342_v48 = vsel %vm330_vm6, %v518_v32, %v324_v44  ;;  %vm259_vm11 = vcmp.ge.f32.partialorder %v180_v26, %v504_v13  ;;  %vm277_vm12 = vcmp.ge.f32.partialorder %v180_v26, %v507_v14  ;;  %s655_s6 = sshll.u32 %s727_s13, 4  ;;  %s656_s6 = int_to_ptr.vmem [resolvable:$false] %s655_s6 }
  0x63   : > { %v354_v49 = vsel %vm348_vm7, %v520_v35, %v336_v47  ;;  %v360_v50 = vsel %vm348_vm7, %v521_v36, %v342_v48  ;;  %v265_v51 = vsel %vm259_vm11, %v505_v5, %v247_v45  ;;  %v271_v52 = vsel %vm259_vm11, %v506_v8, %v253_v46  ;;  %p653_p6 = pnand %p652_p4, %p839_p12  ;;  %s657_s7 = scalar_lea.vmem %s656_s6, 512 }
  0x64   : > { %v372_v53 = vsel %vm366_vm8, %v523_v41, %v354_v49  ;;  %v378_v54 = vsel %vm366_vm8, %v524_v42, %v360_v50  ;;  %v283_v55 = vsel %vm277_vm12, %v508_v9, %v265_v51  ;;  %v289_v56 = vsel %vm277_vm12, %v509_v10, %v271_v52  ;;  %p658_p10 = scmp.lt.s32.totalorder %s975_s17, %s656_s6  ;;  %p659_p13 = scmp.lt.s32.totalorder %s657_s7, %s651_s3 }
  0x65   : > { %v380_v57 = vmul.f32 %v372_v53, %v907_v0  ;;  %vm295_vm13 = vcmp.ge.f32.partialorder %v180_v26, %v510_v15  ;;  %vm313_vm14 = vcmp.ge.f32.partialorder %v180_v26, %v909_v16  ;;  %vm331_vm15 = vcmp.ge.f32.partialorder %v180_v26, %v914_v17  ;;  %p654_p8 = pneg %p653_p6 }
  0x66   : > { %v301_v58 = vsel %vm295_vm13, %v511_v22, %v283_v55  ;;  %v307_v59 = vsel %vm295_vm13, %v512_v23, %v289_v56  ;;  %vm349_vm0 = vcmp.ge.f32.partialorder %v180_v26, %v916_v18  ;;  %vm367_vm1 = vcmp.ge.f32.partialorder %v180_v26, %v918_v19  ;;  %p660_p3 = por %p659_p13, %p658_p10 }
  0x67   : > { %v382_v60 = vadd.f32 %v380_v57, %v378_v54  ;;  %v319_v61 = vsel %vm313_vm14, %v514_v27, %v301_v58  ;;  %v325_v62 = vsel %vm313_vm14, %v515_v28, %v307_v59 }
  0x68   : > { %v337_v63 = vsel %vm331_vm15, %v517_v31, %v319_v61  ;;  %v343_v1 = vsel %vm331_vm15, %v518_v32, %v325_v62  ;;  %p661_p7 = pnand %p660_p3, %p654_p8 }
  0x69   : > { %384 = vst [vmem:[%s176_s15] sm:$0xff] %v382_v60  ;;  %v355_v0 = vsel %vm349_vm0, %v520_v35, %v337_v63  ;;  %v361_v2 = vsel %vm349_vm0, %v521_v36, %v343_v1 }
  0x6a   : > { %v373_v3 = vsel %vm367_vm1, %v523_v41, %v355_v0  ;;  %v379_v4 = vsel %vm367_vm1, %v524_v42, %v361_v2 }
  0x6b   : > { %v381_v5 = vmul.f32 %v373_v3, %v180_v26 }
  0x6d   : > { %v383_v6 = vadd.f32 %v381_v5, %v379_v4 }
  0x6f   : > { %385 = vst [vmem:[%s176_s15 + $0x8] sm:$0xff] %v383_v6 }
  0x70   : > { %664 = shalt.err (!%p661_p7)
}
  0x71   : > { %s665_s20 = scalar_lea.hbm %s980_s28, 256  ;;  %s669_s25 = scalar_lea.hbm %s1026_s2, 512 }
  0x72   : > { %p666_p9 = scmp.ne.s32.totalorder %s980_s28, %s665_s20  ;;  %p670_p5 = scmp.lt.u32.totalorder %s980_s28, %s1026_s2 }
  0x73   : > { %p671_p2 = scmp.lt.u32.totalorder %s669_s25, %s665_s20  ;;  %p673_p4 = scmp.lt.u32.totalorder %s665_s20, %s980_s28 }
  0x74   : > { %p667_p1 = pnand %p666_p9, %p839_p12 }
  0x75   : > { %p672_p11 = por %p671_p2, %p670_p5 }
  0x76   : > { %p668_p0 = pneg %p667_p1 }
  0x77   : > { %p674_p6 = por %p673_p4, %p672_p11 }
  0x79   : > { %p675_p8 = pnand %p674_p6, %p668_p0 }
  0x7b   : > { %678 = shalt.err (!%p675_p8)
}
  0x7c   : > { %s728_s29 = smov 128   ;;  %s729_s4 = smov 8  }
  0x7d   : > { %538 = dma.vmem_to_hbm [thread:$0]  (%p839_p12), %s975_s17, 256, %s980_s28, %s387_s30, %s728_s29, %s728_s29, %s729_s4  }
  0x7e PF: > { %s415_s15 = sand.u32 1, %s709_s9   ;;  %p1041_p10 = scmp.ne.s32.totalorder %s1031_s16, 0 }
  0x7f   : > { %p1042_p13 = scmp.ge.s32.totalorder %s721_s12, 2  ;;  %s416_s5 = scalar_lea.sflag [#allocation4], %s415_s15 }
  0x81   : > { %p549_p3 = pnand %p1042_p13, %p1041_p10 }
  0x83   : > { %704 = dma.done.wait (!%p549_p3), %s416_s5, 256  }
  0x84   : > { %706 = vsyncadd (!%p549_p3), %s416_s5, 4294967040  ;;  %p16_p7 = scmp.ge.s32.totalorder %s801_s21, 4   ;;  %s1043_s9 = smov %s713_s10 }
  0x85   : > { %s1044_s10 = smov %s717_s11  ;;  %s1045_s11 = smov %s835_s8 }
  0x86   : > { %s1046_s12 = smov %s801_s21  ;;  %18 = sbr.rel (!%p16_p7) target bundleno = 6 (0x6), region = 78 }
  0x8d   :  { %421 = vsyncpa [#allocation3], 1 }
  0x8e   :  { %423 = vsyncpa [#allocation3 + $0x1], 1 }
  0x8f   :  { %424 = vsyncpa [#allocation6], 1 }
  0x90   :  { %426 = vsyncpa [#allocation6 + $0x1], 1 }
  0x91   :  { %427 = vsyncpa [#allocation4], 1 }
  0x92   :  { %429 = vsyncpa [#allocation4 + $0x1], 1 }

</bundles_post_ra>
